<compile_context>
chip_gen: v6e
topology: v6e:2x2x1
jax: 0.10.0
libtpu: 0.0.40
codegen_flags: <defaults>
</compile_context>

<pallas_src>
import jax
import jax.numpy as jnp
from jax.experimental import pallas as pl
from jax.experimental.pallas import tpu as pltpu


def _round_up(x, m):
    return ((x + m - 1) // m) * m


def _iou_kernel(pred_ref, target_ref, out_ref, inter_acc, psum_acc, tsum_acc):
    k = pl.program_id(1)
    nk = pl.num_programs(1)

    @pl.when(k == 0)
    def _():
        inter_acc[...] = jnp.zeros_like(inter_acc)
        psum_acc[...] = jnp.zeros_like(psum_acc)
        tsum_acc[...] = jnp.zeros_like(tsum_acc)

    # (TN, TK) lane-dense tile; upcast to f32 inside the kernel.
    p = jax.nn.sigmoid(pred_ref[...].astype(jnp.float32))
    t = target_ref[...].astype(jnp.float32)

    # Row-wise partial reductions over the K chunk (XLU, hidden under DMA).
    inter_acc[...] += jnp.sum(p * t, axis=-1, keepdims=True)
    psum_acc[...] += jnp.sum(p, axis=-1, keepdims=True)
    tsum_acc[...] += jnp.sum(t, axis=-1, keepdims=True)

    @pl.when(k == nk - 1)
    def _():
        inter = inter_acc[...]
        union = psum_acc[...] + tsum_acc[...] - inter
        out_ref[...] = jnp.float32(1.0) - inter / union


def iou_loss(pred, target, *, max_block_elems=512 * 512, max_tk=4096):
    """pred, target: (B, C, H, W). Returns scalar float32 soft-IoU loss."""
    B, C, H, W = pred.shape
    N = B * C
    HW = H * W

    # Lane-dense K tile (multiple of 128), capped; chunk large planes.
    TK = min(_round_up(HW, 128), max_tk)
    HW_pad = _round_up(HW, TK)
    # Rows per step: multiple of 8, sized so the double-buffered footprint
    # (2 inputs x 2 buffers x TN x TK x 4 B) stays small on every chip.
    max_tn = max(8, (max_block_elems // TK) // 8 * 8)
    TN = min(_round_up(N, 8), max_tn)
    N_pad = _round_up(N, TN)

    pred_f = pred.reshape(N, HW)
    target_f = target.reshape(N, HW)
    pad_n, pad_k = N_pad - N, HW_pad - HW
    if pad_n or pad_k:
        # sigmoid(-1e9) == 0 exactly, so padded pred/target contribute
        # nothing to inter / sum(p) / sum(t).  Padded *rows* produce 0/0
        # (NaN) iou, which is sliced off below before the mean.
        pred_f = jnp.pad(pred_f, ((0, pad_n), (0, pad_k)),
                         constant_values=-1e9)
        target_f = jnp.pad(target_f, ((0, pad_n), (0, pad_k)),
                           constant_values=0)

    grid = (N_pad // TN, HW_pad // TK)

    out = pl.pallas_call(
        _iou_kernel,
        out_shape=jax.ShapeDtypeStruct((N_pad, 1), jnp.float32),
        grid_spec=pltpu.PrefetchScalarGridSpec(
            num_scalar_prefetch=0,
            grid=grid,
            in_specs=[
                pl.BlockSpec((TN, TK), lambda i, k: (i, k)),
                pl.BlockSpec((TN, TK), lambda i, k: (i, k)),
            ],
            out_specs=pl.BlockSpec((TN, 1), lambda i, k: (i, 0)),
            scratch_shapes=[
                pltpu.VMEM((TN, 1), jnp.float32),
                pltpu.VMEM((TN, 1), jnp.float32),
                pltpu.VMEM((TN, 1), jnp.float32),
            ],
        ),
        compiler_params=pltpu.CompilerParams(
            # N tiles are independent (parallel, megacore-shardable on v7x);
            # K is the reduction axis (serial accumulation in scratch).
            dimension_semantics=("parallel", "arbitrary"),
        ),
    )(pred_f, target_f)

    # Per-(B,C) iou terms for the real rows; finish the mean in XLA.
    return jnp.mean(out[:N, 0])


def iou_loss_ref(pred, target):
    p = jax.nn.sigmoid(pred.astype(jnp.float32))
    t = target.astype(jnp.float32)
    inter = jnp.sum(p * t, axis=(2, 3))
    union = jnp.sum(p + t, axis=(2, 3)) - inter
    return jnp.mean(1.0 - inter / union)


if __name__ == "__main__":
    key = jax.random.PRNGKey(0)
    k1, k2, k3, k4 = jax.random.split(key, 4)

    # Main case: aligned shapes (H*W = 256 = 2 * 128).
    B, C, H, W = 2, 4, 16, 16
    pred = jax.random.normal(k1, (B, C, H, W), dtype=jnp.float32)
    target = (jax.random.uniform(k2, (B, C, H, W)) > 0.5).astype(jnp.float32)

    out = jax.block_until_ready(iou_loss(pred, target))
    ref = jax.block_until_ready(iou_loss_ref(pred, target))
    assert jnp.allclose(out, ref, rtol=1e-5, atol=1e-5), (out, ref)

    # Exercise the K-reduction grid axis (2 K tiles) on the same data.
    out_k = jax.block_until_ready(iou_loss(pred, target, max_tk=128))
    assert jnp.allclose(out_k, ref, rtol=1e-5, atol=1e-5), (out_k, ref)

    # Exercise N and K padding paths (N=3 rows, H*W=120 not a multiple of 128).
    B2, C2, H2, W2 = 1, 3, 10, 12
    pred2 = jax.random.normal(k3, (B2, C2, H2, W2), dtype=jnp.float32)
    target2 = (jax.random.uniform(k4, (B2, C2, H2, W2)) > 0.5).astype(jnp.float32)
    out2 = jax.block_until_ready(iou_loss(pred2, target2))
    ref2 = jax.block_until_ready(iou_loss_ref(pred2, target2))
    assert jnp.allclose(out2, ref2, rtol=1e-5, atol=1e-5), (out2, ref2)

    print("KERNEL_OK")
</pallas_src>

<mosaic_0001>
module attributes {stable_mosaic.version = 11 : i64} {
  func.func @_iou_kernel(%arg0: i32, %arg1: i32, %arg2: memref<8x256xf32, #tpu.memory_space<vmem>>, %arg3: memref<8x256xf32, #tpu.memory_space<vmem>>, %arg4: memref<8x1xf32, #tpu.memory_space<vmem>>, %arg5: memref<8x1xf32, #tpu.memory_space<vmem>>, %arg6: memref<8x1xf32, #tpu.memory_space<vmem>>, %arg7: memref<8x1xf32, #tpu.memory_space<vmem>>) attributes {dimension_semantics = [#tpu.dimension_semantics<parallel>, #tpu.dimension_semantics<arbitrary>], iteration_bounds = array<i64: 1, 1>, scalar_prefetch = 0 : i64, scratch_operands = 3 : i64, tpu.core_type = #tpu.core_type<tc>, window_params = [{transform_indices = @transform_0, window_bounds = array<i64: 8, 256>}, {transform_indices = @transform_1, window_bounds = array<i64: 8, 256>}, {transform_indices = @transform_2, window_bounds = array<i64: 8, 1>}]} {
    %c0_i32 = arith.constant 0 : i32
    %0 = arith.cmpi eq, %arg1, %c0_i32 : i32
    %1 = arith.extui %0 : i1 to i32
    %c0_i32_0 = arith.constant 0 : i32
    %2 = arith.cmpi ne, %1, %c0_i32_0 : i32
    scf.if %2 {
      %cst_21 = arith.constant 0.000000e+00 : f32
      %29 = vector.broadcast %cst_21 : f32 to vector<8x1xf32>
      %c0_22 = arith.constant 0 : index
      %c0_23 = arith.constant 0 : index
      %30 = vector.load %arg5[%c0_22, %c0_23] : memref<8x1xf32, #tpu.memory_space<vmem>>, vector<8x1xf32>
      tpu.vector_store %arg5[%c0_22, %c0_23], %29 {strides = array<i32>} : memref<8x1xf32, #tpu.memory_space<vmem>>, vector<8x1xf32>,
      %cst_24 = arith.constant 0.000000e+00 : f32
      %31 = vector.broadcast %cst_24 : f32 to vector<8x1xf32>
      %c0_25 = arith.constant 0 : index
      %c0_26 = arith.constant 0 : index
      %32 = vector.load %arg6[%c0_25, %c0_26] : memref<8x1xf32, #tpu.memory_space<vmem>>, vector<8x1xf32>
      tpu.vector_store %arg6[%c0_25, %c0_26], %31 {strides = array<i32>} : memref<8x1xf32, #tpu.memory_space<vmem>>, vector<8x1xf32>,
      %cst_27 = arith.constant 0.000000e+00 : f32
      %33 = vector.broadcast %cst_27 : f32 to vector<8x1xf32>
      %c0_28 = arith.constant 0 : index
      %c0_29 = arith.constant 0 : index
      %34 = vector.load %arg7[%c0_28, %c0_29] : memref<8x1xf32, #tpu.memory_space<vmem>>, vector<8x1xf32>
      tpu.vector_store %arg7[%c0_28, %c0_29], %33 {strides = array<i32>} : memref<8x1xf32, #tpu.memory_space<vmem>>, vector<8x1xf32>,
    } else {
    }
    %c0 = arith.constant 0 : index
    %c0_1 = arith.constant 0 : index
    %3 = vector.load %arg2[%c0, %c0_1] : memref<8x256xf32, #tpu.memory_space<vmem>>, vector<8x256xf32>
    %4 = arith.negf %3 : vector<8x256xf32>
    %5 = math.exp %4 : vector<8x256xf32>
    %cst = arith.constant 1.000000e+00 : f32
    %6 = vector.broadcast %cst : f32 to vector<8x256xf32>
    %7 = arith.addf %6, %5 : vector<8x256xf32>
    %8 = arith.divf %6, %7 : vector<8x256xf32>
    %c0_2 = arith.constant 0 : index
    %c0_3 = arith.constant 0 : index
    %9 = vector.load %arg3[%c0_2, %c0_3] : memref<8x256xf32, #tpu.memory_space<vmem>>, vector<8x256xf32>
    %c0_4 = arith.constant 0 : index
    %c0_5 = arith.constant 0 : index
    %10 = vector.load %arg5[%c0_4, %c0_5] : memref<8x1xf32, #tpu.memory_space<vmem>>, vector<8x1xf32>
    %11 = arith.mulf %8, %9 : vector<8x256xf32>
    %cst_6 = arith.constant dense<0.000000e+00> : vector<8xf32>
    %12 = vector.multi_reduction <add>, %11, %cst_6 [1] : vector<8x256xf32> to vector<8xf32>
    %13 = vector.shape_cast %12 : vector<8xf32> to vector<8x1xf32>
    %14 = arith.addf %10, %13 : vector<8x1xf32>
    %c0_7 = arith.constant 0 : index
    %c0_8 = arith.constant 0 : index
    %15 = vector.load %arg5[%c0_7, %c0_8] : memref<8x1xf32, #tpu.memory_space<vmem>>, vector<8x1xf32>
    tpu.vector_store %arg5[%c0_7, %c0_8], %14 {strides = array<i32>} : memref<8x1xf32, #tpu.memory_space<vmem>>, vector<8x1xf32>,
    %c0_9 = arith.constant 0 : index
    %c0_10 = arith.constant 0 : index
    %16 = vector.load %arg6[%c0_9, %c0_10] : memref<8x1xf32, #tpu.memory_space<vmem>>, vector<8x1xf32>
    %cst_11 = arith.constant dense<0.000000e+00> : vector<8xf32>
    %17 = vector.multi_reduction <add>, %8, %cst_11 [1] : vector<8x256xf32> to vector<8xf32>
    %18 = vector.shape_cast %17 : vector<8xf32> to vector<8x1xf32>
    %19 = arith.addf %16, %18 : vector<8x1xf32>
    %c0_12 = arith.constant 0 : index
    %c0_13 = arith.constant 0 : index
    %20 = vector.load %arg6[%c0_12, %c0_13] : memref<8x1xf32, #tpu.memory_space<vmem>>, vector<8x1xf32>
    tpu.vector_store %arg6[%c0_12, %c0_13], %19 {strides = array<i32>} : memref<8x1xf32, #tpu.memory_space<vmem>>, vector<8x1xf32>,
    %c0_14 = arith.constant 0 : index
    %c0_15 = arith.constant 0 : index
    %21 = vector.load %arg7[%c0_14, %c0_15] : memref<8x1xf32, #tpu.memory_space<vmem>>, vector<8x1xf32>
    %cst_16 = arith.constant dense<0.000000e+00> : vector<8xf32>
    %22 = vector.multi_reduction <add>, %9, %cst_16 [1] : vector<8x256xf32> to vector<8xf32>
    %23 = vector.shape_cast %22 : vector<8xf32> to vector<8x1xf32>
    %24 = arith.addf %21, %23 : vector<8x1xf32>
    %c0_17 = arith.constant 0 : index
    %c0_18 = arith.constant 0 : index
    %25 = vector.load %arg7[%c0_17, %c0_18] : memref<8x1xf32, #tpu.memory_space<vmem>>, vector<8x1xf32>
    tpu.vector_store %arg7[%c0_17, %c0_18], %24 {strides = array<i32>} : memref<8x1xf32, #tpu.memory_space<vmem>>, vector<8x1xf32>,
    %c0_i32_19 = arith.constant 0 : i32
    %26 = arith.cmpi eq, %arg1, %c0_i32_19 : i32
    %27 = arith.extui %26 : i1 to i32
    %c0_i32_20 = arith.constant 0 : i32
    %28 = arith.cmpi ne, %27, %c0_i32_20 : i32
    scf.if %28 {
      %c0_21 = arith.constant 0 : index
      %c0_22 = arith.constant 0 : index
      %29 = vector.load %arg5[%c0_21, %c0_22] : memref<8x1xf32, #tpu.memory_space<vmem>>, vector<8x1xf32>
      %c0_23 = arith.constant 0 : index
      %c0_24 = arith.constant 0 : index
      %30 = vector.load %arg6[%c0_23, %c0_24] : memref<8x1xf32, #tpu.memory_space<vmem>>, vector<8x1xf32>
      %c0_25 = arith.constant 0 : index
      %c0_26 = arith.constant 0 : index
      %31 = vector.load %arg7[%c0_25, %c0_26] : memref<8x1xf32, #tpu.memory_space<vmem>>, vector<8x1xf32>
      %32 = arith.addf %30, %31 : vector<8x1xf32>
      %33 = arith.subf %32, %29 : vector<8x1xf32>
      %34 = arith.divf %29, %33 : vector<8x1xf32>
      %cst_27 = arith.constant 1.000000e+00 : f32
      %35 = vector.broadcast %cst_27 : f32 to vector<8x1xf32>
      %36 = arith.subf %35, %34 : vector<8x1xf32>
      %c0_28 = arith.constant 0 : index
      %c0_29 = arith.constant 0 : index
      %37 = vector.load %arg4[%c0_28, %c0_29] : memref<8x1xf32, #tpu.memory_space<vmem>>, vector<8x1xf32>
      tpu.vector_store %arg4[%c0_28, %c0_29], %36 {strides = array<i32>} : memref<8x1xf32, #tpu.memory_space<vmem>>, vector<8x1xf32>,
    } else {
    }
    return
  }
  func.func @transform_0(%arg0: i32, %arg1: i32) -> (i32, i32) {
    %c0_i32 = arith.constant 0 : i32
    return %arg0, %arg1 : i32, i32
  }
  func.func @transform_1(%arg0: i32, %arg1: i32) -> (i32, i32) {
    %c0_i32 = arith.constant 0 : i32
    return %arg0, %arg1 : i32, i32
  }
  func.func @transform_2(%arg0: i32, %arg1: i32) -> (i32, i32) {
    %c0_i32 = arith.constant 0 : i32
    %c0_i32_0 = arith.constant 0 : i32
    return %arg0, %c0_i32 : i32, i32
  }
}

</mosaic_0001>

<bundles_post_ra>
// kernel: tpu_custom_call.1
= control target key start
LH: loop header
LB: loop body
LE: loop exit
PB: predicated region body
PF: predicated region fallthrough
CT: control target
= control target key end

     0   :  { %7 = vsyncpa [#allocation6], 0  ;;  %s191_s0 = inlined_call_operand.hbm [shape: f32[8,256], index: 0, kind: input, shape index: {}]   ;;  %s192_s1 = inlined_call_operand.hbm [shape: f32[8,256], index: 1, kind: input, shape index: {}]   ;;  %s193_s2 = inlined_call_operand.vmem [shape: f32[8,1], index: 2, kind: output, shape index: {}]  }
   0x1   :  { %8 = vsyncpa [#allocation8], 0  ;;  %s157_s9 = smov [#allocation5]   ;;  %s158_s11 = smov [#allocation7]  }
   0x2   :  { %s15_s10 = sshll.u32 %s157_s9, 4  ;;  %s25_s12 = sshll.u32 %s158_s11, 4  ;;  %s16_s10 = int_to_ptr.vmem [resolvable:$true] %s15_s10  ;;  %s26_s12 = int_to_ptr.vmem [resolvable:$true] %s25_s12 }
   0x3   :  { %s121_s13 = scalar_lea.vmem %s16_s10, 256  ;;  %p126_p1 = scmp.lt.s32.totalorder %s16_s10, %s16_s10 }
   0x4   :  { %p122_p0 = scmp.ne.s32.totalorder %s16_s10, %s121_s13  ;;  %p127_p2 = scmp.lt.s32.totalorder %s121_s13, %s121_s13 }
   0x6   :  { %p128_p3 = por %p127_p2, %p126_p1 }
   0x8   :  { %p129_p4 = pnand %p128_p3, %p122_p0 }
   0xa   :  { %132 = shalt.err (!%p129_p4)
}
   0xb   :  { %18 = dma.hbm_to_vmem [thread:$0]  %s191_s0, 256, %s16_s10, [#allocation6]  }
   0xc   :  { %s141_s16 = scalar_lea.vmem %s26_s12, 256  ;;  %p146_p6 = scmp.lt.s32.totalorder %s26_s12, %s26_s12 }
   0xd   :  { %p142_p5 = scmp.ne.s32.totalorder %s26_s12, %s141_s16  ;;  %p147_p7 = scmp.lt.s32.totalorder %s141_s16, %s141_s16 }
   0xf   :  { %p148_p8 = por %p147_p7, %p146_p6 }
  0x11   :  { %p149_p9 = pnand %p148_p8, %p142_p5 }
  0x13   :  { %152 = shalt.err (!%p149_p9)
}
  0x14   :  { %28 = dma.hbm_to_vmem [thread:$0]  %s192_s1, 256, %s26_s12, [#allocation8]  }
  0x15   :  { %153 = dma.done.wait [#allocation6], 256  }
  0x16   :  { %154 = vsyncadd [#allocation6], 4294967040 }
  0x17   :  { %155 = dma.done.wait [#allocation8], 256  }
  0x18   :  { %156 = vsyncadd [#allocation8], 4294967040  ;;  %vm39_vm0 = vcmask 7168   ;;  %v159_v0 = vmov 0.0   ;;  %v43_v1 = vld [vmem:[#allocation5] sm:$0xff]  ;;  %v44_v2 = vld [vmem:[#allocation5 + $0x8] sm:$0xff] }
  0x19   :  { %41 = vst.msk [vmem:[#allocation3] sm:$0xff] %vm39_vm0, %v159_v0  ;;  %40 = vst.msk [vmem:[#allocation2] sm:$0xff] %vm39_vm0, %v159_v0  ;;  %v98_v3 = vmul.f32 -1.442695, %v43_v1  ;;  %v99_v4 = vmul.f32 -1.442695, %v44_v2 }
  0x1a   :  { %42 = vst.msk [vmem:[#allocation4] sm:$0xff] %vm39_vm0, %v159_v0  ;;  %v57_v9 = vld [vmem:[#allocation7] sm:$0xff]  ;;  %v58_v10 = vld [vmem:[#allocation7 + $0x8] sm:$0xff] }
  0x1b   :  { %103 = vpow2.f32 %v98_v3  ;;  %v75_v16 = vadd.f32 %v58_v10, %v57_v9 }
  0x1c   :  { %105 = vpow2.f32 %v99_v4 }
  0x20   :  { %v68_v18 = vld [vmem:[#allocation3] sm:$0xff]  ;;  %v59_v20 = vld [vmem:[#allocation2] sm:$0xff] }
  0x21   :  { %v74_v22 = vld [vmem:[#allocation4] sm:$0xff] }
  0x28   :  { %v104_v5 = vpop.eup %103 }
  0x29   :  { %v106_v6 = vpop.eup %105  ;;  %v51_v7 = vadd.f32 1.0, %v104_v5 }
  0x2a   :  { %v52_v8 = vadd.f32 1.0, %v106_v6 }
  0x2b   :  { %107 = vrcp.f32 %v51_v7 }
  0x2c   :  { %109 = vrcp.f32 %v52_v8 }
  0x38   :  { %v108_v11 = vpop.eup %107 }
  0x39   :  { %v110_v12 = vpop.eup %109  ;;  %v60_v13 = vmul.f32 %v108_v11, %v57_v9 }
  0x3a   :  { %v69_v14 = vadd.f32 %v110_v12, %v108_v11  ;;  %v61_v15 = vmul.f32 %v110_v12, %v58_v10 }
  0x3c   :  { %70 = vadd.xlane.f32.xlu0 %v69_v14  ;;  %v62_v17 = vadd.f32 %v61_v15, %v60_v13 }
  0x3e   :  { %63 = vadd.xlane.f32.xlu1 %v62_v17 }
  0x40   :  { %76 = vadd.xlane.f32.xlu0 %v75_v16 }
  0xc5   :  { %v71_v19 = vpop.xlane.xlu0 %70 }
  0xc6   :  { %v72_v21 = vadd.f32 %v71_v19, %v68_v18 }
  0xc7   :  { %v64_v23 = vpop.xlane.xlu1 %63 }
  0xc8   :  { %73 = vst.msk [vmem:[#allocation3] sm:$0xff] %vm39_vm0, %v72_v21  ;;  %v65_v24 = vadd.f32 %v64_v23, %v59_v20 }
  0xc9   :  { %v77_v25 = vpop.xlane.xlu0 %76 }
  0xca   :  { %v78_v26 = vadd.f32 %v77_v25, %v74_v22  ;;  %67 = vst.msk [vmem:[#allocation2] sm:$0xff] %vm39_vm0, %v65_v24 }
  0xcc   :  { %79 = vst.msk [vmem:[#allocation4] sm:$0xff] %vm39_vm0, %v78_v26 }
  0xcf   :  { %v84_v27 = vld [vmem:[#allocation3] sm:$0xff] }
  0xd1   :  { %v83_v29 = vld [vmem:[#allocation2] sm:$0xff] }
  0xd3   :  { %v85_v28 = vld [vmem:[#allocation4] sm:$0xff] }
  0xd4   :  { %v86_v30 = vadd.f32 %v85_v28, %v84_v27 }
  0xd6   :  { %v87_v31 = vsub.f32 %v86_v30, %v83_v29 }
  0xd8   :  { %111 = vrcp.f32 %v87_v31 }
  0xe5   :  { %v112_v32 = vpop.eup %111 }
  0xe6   :  { %v89_v33 = vmul.f32 %v112_v32, %v83_v29 }
  0xe8   :  { %v90_v34 = vsub.f32 1.0, %v89_v33 }
  0xea   :  { %91 = vst.msk [vmem:[%s193_s2] sm:$0xff] %vm39_vm0, %v90_v34 }
  0xeb   :  { %96 = vsyncpa [#allocation6], 1 }
  0xec   :  { %97 = vsyncpa [#allocation8], 1 }

</bundles_post_ra>
